<compile_context>
chip_gen: v6e
topology: v6e:2x2x1
jax: 0.10.0
libtpu: 0.0.40
codegen_flags: <defaults>
</compile_context>

<pallas_src>
import functools

import jax
import jax.numpy as jnp
from jax.experimental import pallas as pl
from jax.experimental.pallas import tpu as pltpu


# ----------------------------- kernel ---------------------------------------


def _attn_softmax_kernel(q_ref, k_ref, out_ref, *, n_keys, n_keys_pad):
    # q_ref: (1, 1, TQ, d)   k_ref: (1, 1, d, N_pad)   out_ref: (1, 1, TQ, N_pad)
    q = q_ref[0, 0]                       # (TQ, d)   (scale folded into weights)
    kt = k_ref[0, 0]                      # (d, N_pad) lane-dense on N

    # Standard (TQ,d)x(d,N) contraction on the MXU, f32 accumulation.
    sim = jnp.dot(q, kt, preferred_element_type=jnp.float32)   # (TQ, N_pad) f32

    if n_keys_pad != n_keys:
        # Mask padded key columns to -inf so they contribute 0 after exp.
        col = jax.lax.broadcasted_iota(jnp.int32, sim.shape, 1)
        sim = jnp.where(col < n_keys, sim, -jnp.inf)

    # Row-wise, numerically stable softmax. Reciprocal goes to the EUP slot and
    # turns the N^2 divides into multiplies.
    m = jnp.max(sim, axis=-1, keepdims=True)
    p = jnp.exp(sim - m)
    denom = jnp.sum(p, axis=-1, keepdims=True)
    inv = pl.reciprocal(denom, approx=True)
    out_ref[0, 0] = (p * inv).astype(out_ref.dtype)


# ----------------------------- sizing helpers --------------------------------


def _round_up(x, m):
    return (x + m - 1) // m * m


def _vmem_capacity_bytes():
    """Generation-aware VMEM capacity (64 MiB/TC on v7x, 128 MiB on v5e/v6e)."""
    try:
        info = pltpu.get_tpu_info()
        cap = getattr(info, "vmem_capacity_bytes", None)
        if cap:
            return int(cap)
    except Exception:
        pass
    return 64 * 1024 * 1024   # conservative fallback (v7x per-TC)


def _pick_tq(n_pad, d, qk_bytes, out_bytes, budget_bytes, *, tq_max=1024, align=16):
    """Pick a query-tile row count so all double-buffered blocks + live f32
    temporaries fit inside `budget_bytes` of VMEM."""
    # Resident K^T tile (d, n_pad): lane-dense on N, double-buffered.
    k_cost = 2 * d * n_pad * qk_bytes
    avail = max(budget_bytes - k_cost, 0)
    per_row = (
        2 * max(d, 128) * qk_bytes    # q block (TQ, d) dbuf, minor dim lane-padded to 128
        + 2 * n_pad * out_bytes       # out block (TQ, N_pad) dbuf
        + 3 * n_pad * 4               # live f32 temporaries: sim, p, p*inv
    )
    tq = int(avail // per_row)
    tq = max(align, min(tq_max, tq))
    return max(align, (tq // align) * align)


# ----------------------------- wrapper ---------------------------------------


def attention_pallas(fmaps0, fmaps1, wq, wk, *, heads, dim_head, temp=None,
                     tq=None, qk_dtype=jnp.bfloat16, out_dtype=jnp.bfloat16):
    """fmaps0/fmaps1: (b, c, H, W) NCHW (PyTorch layout).
    wq/wk: (heads*dim_head, c) 1x1-conv weights, head-major along rows.
    Returns attn of shape (b, heads, H*W, H*W) (squeezed at axis 1 if heads==1).
    Defaults: bf16 q/k (f32 MXU accumulation) and bf16 output (softmax math in
    f32, cast only at the final store). Pass jnp.float32 for full precision."""
    b, c, H, W = fmaps0.shape
    N = H * W
    scale = float(dim_head) ** (-0.5)
    if temp is not None:
        scale = scale * float(temp)

    # ---- projection hoisted out of the kernel (K=c is a terrible MXU shape) ----
    x0 = fmaps0.reshape(b, c, N).astype(jnp.float32)        # (b, c, N), N = H*W row-major
    x1 = fmaps1.reshape(b, c, N).astype(jnp.float32)
    # channel index = head*dim_head + d  ->  (heads, dim_head, c)
    wq_h = wq.reshape(heads, dim_head, c).astype(jnp.float32)
    wk_h = wk.reshape(heads, dim_head, c).astype(jnp.float32)
    # fold the softmax scale into the q weights (removes a per-step VPU multiply)
    q = jnp.einsum("hdc,bcn->bhnd", wq_h * scale, x0).astype(qk_dtype)    # (b, h, N, d)
    # K pre-transposed: lane-dense on N, MXU-ready (d, N) RHS
    kT = jnp.einsum("hdc,bcn->bhdn", wk_h, x1).astype(qk_dtype)           # (b, h, d, N)

    # ---- pad the key/output axis to a lane-dense multiple of 128 ----
    n_pad = _round_up(N, 128)
    if n_pad != N:
        kT = jnp.pad(kT, ((0, 0), (0, 0), (0, 0), (0, n_pad - N)))

    qk_bytes = jnp.dtype(qk_dtype).itemsize
    out_bytes = jnp.dtype(out_dtype).itemsize
    # bf16 blocks need a (16,128) min tile on the second-to-last dim.
    align = 16 if (qk_bytes < 4 or out_bytes < 4) else 8

    # ---- generation-aware VMEM budget ----
    cap = _vmem_capacity_bytes()
    budget = max(16 * 1024 * 1024, int(cap * 0.55))     # ~35 MiB on v7x, ~70 MiB on v5e/v6e
    vmem_limit = max(budget, int(cap * 0.75))           # ~48 MiB on v7x, ~96 MiB on v5e/v6e

    if tq is None:
        tq = _pick_tq(n_pad, dim_head, qk_bytes, out_bytes, budget, align=align)
    # Minimize query-row padding: smallest aligned tile achieving the implied
    # tile count (padded rows burn N exps + a full N-wide garbage writeback).
    tq = max(align, min(int(tq), _round_up(N, align)))
    nq_tiles = pl.cdiv(N, tq)
    tq_eff = _round_up(pl.cdiv(N, nq_tiles), align)
    nq_tiles = pl.cdiv(N, tq_eff)
    n_q_pad = nq_tiles * tq_eff
    if n_q_pad != N:
        # Pad query rows only; padded rows are independent (row-wise softmax)
        # and are sliced off below.
        q = jnp.pad(q, ((0, 0), (0, 0), (0, n_q_pad - N), (0, 0)))

    kernel = functools.partial(_attn_softmax_kernel, n_keys=N, n_keys_pad=n_pad)

    out = pl.pallas_call(
        kernel,
        out_shape=jax.ShapeDtypeStruct((b, heads, n_q_pad, n_pad), out_dtype),
        grid_spec=pltpu.PrefetchScalarGridSpec(
            num_scalar_prefetch=0,
            grid=(b, heads, nq_tiles),
            in_specs=[
                # query tile: marches with the innermost grid axis
                pl.BlockSpec((1, 1, tq_eff, dim_head),
                             lambda i, j, qi: (i, j, qi, 0)),
                # key tile (d, N_pad): block index invariant over qi -> stays
                # resident, no re-DMA per query tile; lane-dense on N
                pl.BlockSpec((1, 1, dim_head, n_pad),
                             lambda i, j, qi: (i, j, 0, 0)),
            ],
            out_specs=pl.BlockSpec((1, 1, tq_eff, n_pad),
                                   lambda i, j, qi: (i, j, qi, 0)),
        ),
        compiler_params=pltpu.CompilerParams(
            # all axes independent (softmax is row-wise) -> megacore can shard
            dimension_semantics=("parallel", "parallel", "parallel"),
            vmem_limit_bytes=vmem_limit,
        ),
    )(q, kT)

    if n_q_pad != N or n_pad != N:
        out = out[:, :, :N, :N]
    if heads == 1:
        out = jnp.squeeze(out, axis=1)   # matches torch .squeeze(1)
    return out


# ----------------------------- reference -------------------------------------


def attention_reference(fmaps0, fmaps1, wq, wk, *, heads, dim_head, temp=None):
    """Pure-JAX reference mirroring the PyTorch forward."""
    b, c, H, W = fmaps0.shape
    scale = float(dim_head) ** (-0.5)
    if temp is not None:
        scale = scale * float(temp)
    q = jnp.einsum("oc,bchw->bohw", wq, fmaps0)
    k = jnp.einsum("oc,bchw->bohw", wk, fmaps1)
    q = q.reshape(b, heads, dim_head, H, W).transpose(0, 1, 3, 4, 2)
    k = k.reshape(b, heads, dim_head, H, W).transpose(0, 1, 3, 4, 2)
    q = q * scale
    sim = jnp.einsum("bhxyd,bhuvd->bhxyuv", q, k)
    sim = sim.reshape(b, heads, H * W, H * W)
    attn = jax.nn.softmax(sim, axis=-1)
    if heads == 1:
        attn = jnp.squeeze(attn, axis=1)
    return attn


if __name__ == "__main__":
    key = jax.random.PRNGKey(0)
    k0, k1, k2, k3 = jax.random.split(key, 4)

    # --- Test 1: multi-head, temp scaling, default bf16 q/k and bf16 output ---
    b, c, H, W = 2, 4, 8, 8
    heads, dim_head = 2, 32
    inner_dim = heads * dim_head

    fmaps0 = jax.random.normal(k0, (b, c, H, W), dtype=jnp.float32)
    fmaps1 = jax.random.normal(k1, (b, c, H, W), dtype=jnp.float32)
    # Conv2d(input_dim, inner_dim, 1, bias=False) weight is (inner_dim, c, 1, 1);
    # deterministic synthetic init, squeezed to (inner_dim, c).
    wq = jax.random.normal(k2, (inner_dim, c), dtype=jnp.float32) * 0.1
    wk = jax.random.normal(k3, (inner_dim, c), dtype=jnp.float32) * 0.1

    out = attention_pallas(fmaps0, fmaps1, wq, wk,
                           heads=heads, dim_head=dim_head, temp=2.0)
    out = jax.block_until_ready(out)
    ref = attention_reference(fmaps0, fmaps1, wq, wk,
                              heads=heads, dim_head=dim_head, temp=2.0)
    assert out.shape == ref.shape, (out.shape, ref.shape)
    assert jnp.allclose(out.astype(jnp.float32), ref, atol=2e-2, rtol=2e-2), \
        "mismatch vs reference (test 1)"

    # --- Test 2: single head (exercises squeeze) + key-column padding (N=81 -> 128)
    #     + query-row padding (TQ=32 -> 96 padded rows) ---
    heads2, dim_head2 = 1, 16
    inner2 = heads2 * dim_head2
    H2 = W2 = 9
    k4, k5, k6, k7 = jax.random.split(jax.random.PRNGKey(1), 4)
    f0 = jax.random.normal(k4, (b, c, H2, W2), dtype=jnp.float32)
    f1 = jax.random.normal(k5, (b, c, H2, W2), dtype=jnp.float32)
    wq2 = jax.random.normal(k6, (inner2, c), dtype=jnp.float32) * 0.1
    wk2 = jax.random.normal(k7, (inner2, c), dtype=jnp.float32) * 0.1

    out2 = attention_pallas(f0, f1, wq2, wk2,
                            heads=heads2, dim_head=dim_head2, tq=32)
    out2 = jax.block_until_ready(out2)
    ref2 = attention_reference(f0, f1, wq2, wk2, heads=heads2, dim_head=dim_head2)
    assert out2.shape == ref2.shape, (out2.shape, ref2.shape)
    assert jnp.allclose(out2.astype(jnp.float32), ref2, atol=2e-2, rtol=2e-2), \
        "mismatch vs reference (test 2)"

    # --- Test 3: full-precision f32 path (tighter tolerance) ---
    out3 = attention_pallas(fmaps0, fmaps1, wq, wk,
                            heads=heads, dim_head=dim_head,
                            qk_dtype=jnp.float32, out_dtype=jnp.float32)
    out3 = jax.block_until_ready(out3)
    ref3 = attention_reference(fmaps0, fmaps1, wq, wk,
                               heads=heads, dim_head=dim_head)
    assert out3.shape == ref3.shape, (out3.shape, ref3.shape)
    assert jnp.allclose(out3, ref3, atol=1e-3, rtol=1e-3), \
        "mismatch vs reference (test 3)"

    print("KERNEL_OK")
</pallas_src>

<mosaic_0001>
module attributes {stable_mosaic.version = 11 : i64} {
  func.func @_attn_softmax_kernel(%arg0: i32, %arg1: i32, %arg2: i32, %arg3: memref<1x1x64x32xbf16, #tpu.memory_space<vmem>>, %arg4: memref<1x1x32x128xbf16, #tpu.memory_space<vmem>>, %arg5: memref<1x1x64x128xbf16, #tpu.memory_space<vmem>>) attributes {dimension_semantics = [#tpu.dimension_semantics<parallel>, #tpu.dimension_semantics<parallel>, #tpu.dimension_semantics<parallel>], iteration_bounds = array<i64: 2, 2, 1>, scalar_prefetch = 0 : i64, scratch_operands = 0 : i64, tpu.core_type = #tpu.core_type<tc>, window_params = [{transform_indices = @transform_0, window_bounds = array<i64: 1, 1, 64, 32>}, {transform_indices = @transform_1, window_bounds = array<i64: 1, 1, 32, 128>}, {transform_indices = @transform_2, window_bounds = array<i64: 1, 1, 64, 128>}]} {
    %c0 = arith.constant 0 : index
    %c0_0 = arith.constant 0 : index
    %c0_1 = arith.constant 0 : index
    %c0_2 = arith.constant 0 : index
    %0 = vector.load %arg3[%c0, %c0_0, %c0_1, %c0_2] : memref<1x1x64x32xbf16, #tpu.memory_space<vmem>>, vector<1x1x64x32xbf16>
    %1 = vector.shape_cast %0 : vector<1x1x64x32xbf16> to vector<64x32xbf16>
    %c0_3 = arith.constant 0 : index
    %c0_4 = arith.constant 0 : index
    %c0_5 = arith.constant 0 : index
    %c0_6 = arith.constant 0 : index
    %2 = vector.load %arg4[%c0_3, %c0_4, %c0_5, %c0_6] : memref<1x1x32x128xbf16, #tpu.memory_space<vmem>>, vector<1x1x32x128xbf16>
    %3 = vector.shape_cast %2 : vector<1x1x32x128xbf16> to vector<32x128xbf16>
    %cst = arith.constant dense<0.000000e+00> : vector<64x128xf32>
    %4 = tpu.matmul %1, %3, %cst {dimension_numbers = #tpu.dot_dimension_numbers<[1], [0], [0], [1], [0, 0, 1, 1], [], []>} : vector<64x32xbf16>, vector<32x128xbf16>, vector<64x128xf32> -> vector<64x128xf32>
    %5 = tpu.iota {dimensions = array<i32: 1>} : vector<64x128xi32>
    %c64_i32 = arith.constant 64 : i32
    %6 = vector.broadcast %c64_i32 : i32 to vector<64x128xi32>
    %7 = arith.cmpi slt, %5, %6 : vector<64x128xi32>
    %cst_7 = arith.constant 0xFF800000 : f32
    %8 = vector.broadcast %cst_7 : f32 to vector<64x128xf32>
    %9 = arith.select %7, %4, %8 : vector<64x128xi1>, vector<64x128xf32>
    %cst_8 = arith.constant dense<0xFF800000> : vector<64xf32>
    %10 = vector.multi_reduction <maximumf>, %9, %cst_8 [1] : vector<64x128xf32> to vector<64xf32>
    %11 = vector.shape_cast %10 : vector<64xf32> to vector<64x1xf32>
    %12 = vector.broadcast %11 : vector<64x1xf32> to vector<64x128xf32>
    %13 = arith.subf %9, %12 : vector<64x128xf32>
    %14 = math.exp %13 : vector<64x128xf32>
    %cst_9 = arith.constant dense<0.000000e+00> : vector<64xf32>
    %15 = vector.multi_reduction <add>, %14, %cst_9 [1] : vector<64x128xf32> to vector<64xf32>
    %16 = vector.shape_cast %15 : vector<64xf32> to vector<64x1xf32>
    %17 = tpu.reciprocal %16 {approx = true} : vector<64x1xf32> -> vector<64x1xf32>
    %18 = vector.broadcast %17 : vector<64x1xf32> to vector<64x128xf32>
    %19 = arith.mulf %14, %18 : vector<64x128xf32>
    %20 = arith.truncf %19 : vector<64x128xf32> to vector<64x128xbf16>
    %c0_10 = arith.constant 0 : index
    %c0_11 = arith.constant 0 : index
    %c0_12 = arith.constant 0 : index
    %c0_13 = arith.constant 0 : index
    %21 = vector.load %arg5[%c0_10, %c0_11, %c0_12, %c0_13] : memref<1x1x64x128xbf16, #tpu.memory_space<vmem>>, vector<1x1x64x128xbf16>
    %22 = vector.shape_cast %21 : vector<1x1x64x128xbf16> to vector<64x128xbf16>
    %23 = vector.shape_cast %20 : vector<64x128xbf16> to vector<1x1x64x128xbf16>
    tpu.vector_store %arg5[%c0_10, %c0_11, %c0_12, %c0_13], %23 {strides = array<i32>} : memref<1x1x64x128xbf16, #tpu.memory_space<vmem>>, vector<1x1x64x128xbf16>,
    return
  }
  func.func @transform_0(%arg0: i32, %arg1: i32, %arg2: i32) -> (i32, i32, i32, i32) {
    %c0_i32 = arith.constant 0 : i32
    %c0_i32_0 = arith.constant 0 : i32
    return %arg0, %arg1, %arg2, %c0_i32 : i32, i32, i32, i32
  }
  func.func @transform_1(%arg0: i32, %arg1: i32, %arg2: i32) -> (i32, i32, i32, i32) {
    %c0_i32 = arith.constant 0 : i32
    %c0_i32_0 = arith.constant 0 : i32
    %c0_i32_1 = arith.constant 0 : i32
    return %arg0, %arg1, %c0_i32, %c0_i32_0 : i32, i32, i32, i32
  }
  func.func @transform_2(%arg0: i32, %arg1: i32, %arg2: i32) -> (i32, i32, i32, i32) {
    %c0_i32 = arith.constant 0 : i32
    %c0_i32_0 = arith.constant 0 : i32
    return %arg0, %arg1, %arg2, %c0_i32 : i32, i32, i32, i32
  }
}

</mosaic_0001>

<bundles_post_ra>
// kernel: tpu_custom_call.1
= control target key start
LH: loop header
LB: loop body
LE: loop exit
PB: predicated region body
PF: predicated region fallthrough
CT: control target
= control target key end

     0   :  { %7 = vsyncpa [#allocation3], 0  ;;  %s1074_s0 = inlined_call_operand.vmem [shape: bf16[2,2,64,32], index: 0, kind: input, shape index: {}]   ;;  %s1075_s1 = inlined_call_operand.vmem [shape: bf16[2,2,32,128], index: 1, kind: input, shape index: {}]   ;;  %s1076_s2 = inlined_call_operand.hbm [shape: bf16[2,2,64,128], index: 2, kind: output, shape index: {}]  }
   0x1   :  { %9 = vsyncpa [#allocation3 + $0x1], 0  ;;  %s920_s9 = smov 0   ;;  %s922_s10 = smov 0  }
   0x2   :  { %s924_s11 = smov 0   ;;  %s926_s12 = smov 0  }
   0x3   :  { %s928_s13 = smov 0   ;;  %s930_s14 = smov 0  }
   0x4   :  { %s932_s15 = smov 0   ;;  %s934_s16 = smov 0  }
   0x5 LB: > { %s608_s17 = sadd.s32 4294967295, %s900_s16   ;;  %s609_s18 = sadd.s32 4294967294, %s900_s16   ;;  %s900_s16 = sphi %s934_s16, %s15_s16   ;;  %s896_s15 = sphi %s932_s15, %s1088_s15   ;;  %s892_s14 = sphi %s930_s14, %s1087_s14   ;;  %s888_s13 = sphi %s928_s13, %s1086_s13   ;;  %s884_s12 = sphi %s926_s12, %s1085_s12   ;;  %s880_s11 = sphi %s924_s11, %s1084_s11   ;;  %s876_s10 = sphi %s922_s10, %s1083_s10   ;;  %s872_s9 = sphi %s920_s9, %s1082_s9  }
   0x6   : > { %s30_s19 = sadd.s32 1, %s892_s14  ;;  %s34_s20 = sadd.s32 1, %s896_s15 }
   0x7   : > { %p32_p0 = scmp.ge.s32.totalorder %s30_s19, 2  ;;  %p113_p1 = scmp.ne.s32.totalorder %s880_s11, %s876_s10 }
   0x8   : > { %p114_p2 = scmp.eq.s32.totalorder %s608_s17, 3  ;;  %p119_p5 = scmp.ne.s32.totalorder %s876_s10, %s872_s9 }
   0x9   : > { %s1090_s19 = smov (%p32_p0, %s30_s19), 0  ;;  %s1092_s20 = smov (!%p32_p0, %s34_s20), %s896_s15 }
   0xa   : > { %s97_s21 = ssub.s32 %s892_s14, %s1090_s19  ;;  %p971_p3 = por %p114_p2, %p113_p1 }
   0xb   : > { %p36_p4 = scmp.ge.s32.totalorder %s1092_s20, 2  ;;  %p120_p6 = scmp.eq.s32.totalorder %s609_s18, 3 }
   0xc   : > { %p612_p7 = scmp.ge.s32.totalorder %s900_s16, 1  ;;  %p167_p9 = scmp.lt.s32.totalorder %s900_s16, 5 }
   0xd   : > { %s1094_s20 = smov (%p36_p4, %s1092_s20), 0  ;;  %p980_p8 = por %p120_p6, %p119_p5 }
   0xe   : > { %1079 = sst [smem:[#allocation5_spill]] %s1094_s20  ;;  %s96_s24 = ssub.s32 %s896_s15, %s1094_s20 }
   0xf   : > { %s103_s25 = sadd.s32 1, %s880_s11  ;;  %s98_s26 = sor.u32 %s97_s21, %s96_s24 }
  0x10   : > { %p168_p10 = pnand %p612_p7, %p167_p9  ;;  %p101_p11 = scmp.eq.s32.totalorder %s98_s26, 0 }
  0x11   : > { %p207_p12 = scmp.lt.s32.totalorder (!%p168_p10), %s888_s13, 1  ;;  %p209_p13 = scmp.lt.s32.totalorder (!%p168_p10), %s884_s12, 1 }
  0x12   : > { %s989_s27 = scalar_select %p101_p11, %s880_s11, %s103_s25  }
  0x13   : > { %171 = sbr.rel (%p168_p10) target bundleno = 578 (0x242), region = 28  ;;  %s902_s18 = smov (!%p168_p10), [#allocation2]  }
  0x14   : > { %s812_s21 = sshll.u32 (!%p168_p10), %s902_s18, 4  ;;  %s813_s21 = int_to_ptr.vmem [resolvable:$false] %s812_s21 }
  0x18   : > { %s208_s28 = scalar_select %p207_p12, %s888_s13, 1  ;;  %vm275_vm0 = vcmask 261120   ;;  %v353_v6 = vlaneseq }
  0x19   : > { %s210_s29 = scalar_select %p209_p13, %s884_s12, 1 }
  0x1a   : > { %s615_s30 = sshll.u32 %s208_s28, 4  ;;  %s618_s3 = sshll.u32 %s208_s28, 3  ;;  %v354_v7 = vand.u32 127, %v353_v6 }
  0x1b   : > { %s614_s4 = sshll.u32 %s210_s29, 3  ;;  %s617_s5 = sshll.u32 %s210_s29, 2 }
  0x1c   : > { %s226_s6 = sadd.s32 %s618_s3, %s617_s5  ;;  %s216_s7 = sadd.s32 %s615_s30, %s614_s4  ;;  %vm355_vm1 = vcmp.lt.s32.totalorder %v354_v7, 64 }
  0x1d   : > { %s619_s8 = sshll.u32 %s226_s6, 2  ;;  %s616_s17 = sshll.u32 %s216_s7, 2 }
  0x1e   : > { %s228_s24 = scalar_lea.vmem %s1075_s1, %s619_s8  ;;  %s218_s20 = scalar_lea.vmem %s1074_s0, %s616_s17 }
  0x1f   : > { %v770_v0 = vld [vmem:[%s228_s24 + $0x8] sm:$0xff]   ;;  %v771_v1 = vld [vmem:[%s228_s24] sm:$0xff]   ;;  %v773_v3 = vld [vmem:[%s218_s20 + $0x10] sm:$0xff]   ;;  %s639_s30 = sshll.u32 %s884_s12, 3  ;;  %s640_s3 = sshll.u32 %s888_s13, 4 }
  0x20   : > { %681 = vmatprep.subr.bf16.mxu0 %v770_v0  ;;  %693 = vmatprep.subr.bf16.mxu1 %v770_v0  ;;  %v772_v2 = vld [vmem:[%s218_s20] sm:$0xff]   ;;  %v774_v4 = vld [vmem:[%s218_s20 + $0x8] sm:$0xff]   ;;  %v775_v5 = vld [vmem:[%s218_s20 + $0x18] sm:$0xff]   ;;  %s203_s20 = sand.u32 1, %s876_s10   ;;  %s491_s4 = sadd.s32 %s640_s3, %s639_s30 }
  0x21   : > { %682 = vmatpush3.bf16.msra.mxu0 %v770_v0  ;;  %695 = vmatpush3.bf16.msra.mxu1 %v770_v0  ;;  %s613_s28 = sshll.u32 %s203_s20, 5  ;;  %s641_s5 = sshll.u32 %s491_s4, 6 }
  0x22   : > { %683 = vmatprep.subr.bf16.mxu0 %v771_v1  ;;  %694 = vmatprep.subr.bf16.mxu1 %v771_v1  ;;  %s205_s29 = scalar_lea.vmem [#allocation2], %s613_s28  ;;  %s1017_s13 = scalar_lea.hbm %s1076_s2, %s641_s5 }
  0x23   : > { %685 = vmatprep.mubr.msk.bf16.mxu0 %vm275_vm0, %v772_v2  ;;  %689 = vmatprep.mubr.msk.bf16.mxu1 %vm275_vm0, %v773_v3  ;;  %s494_s6 = sshll.u32 %s205_s29, 4  ;;  %s1023_s8 = scalar_lea.sflag [#allocation3], %s203_s20  ;;  %s1019_s6 = int_to_ptr.vmem [resolvable:$true] %s494_s6 }
  0x24   : > { %s808_s17 = scalar_lea.vmem %s1019_s6, 512  ;;  %s814_s24 = scalar_lea.vmem %s813_s21, 1024 }
  0x25   : > { %684 = vmatpush3.bf16.msra.mxu0 %v771_v1  ;;  %696 = vmatpush3.bf16.msra.mxu1 %v771_v1  ;;  %p809_p0 = scmp.ne.s32.totalorder %s1019_s6, %s808_s17  ;;  %p815_p4 = scmp.lt.s32.totalorder %s1019_s6, %s813_s21 }
  0x26   : > { %p816_p5 = scmp.lt.s32.totalorder %s814_s24, %s808_s17 }
  0x27   : > { %p810_p1 = pnand %p809_p0, %p971_p3 }
  0x28   : > { %686 = vmatmul.mubr.msk.bf16.vlgmr.msra.gmra.mxu0 %vm275_vm0, %v774_v4  ;;  %690 = vmatmul.mubr.msk.bf16.vlgmr.msra.gmra.mxu1 %vm275_vm0, %v775_v5  ;;  %p817_p6 = por %p816_p5, %p815_p4 }
  0x29   : > { %p811_p2 = pneg %p810_p1 }
  0x2b   : > { %p818_p7 = pnand %p817_p6, %p811_p2 }
  0xe8   : > { %v687_v8 = vpop.f32.mrf.mxu0  ;;  %v691_v9 = vpop.f32.mrf.mxu1 }
  0xe9   : > { %v358_v10 = vsel %vm355_vm1, %v687_v8, -inf  ;;  %v362_v23 = vsel %vm355_vm1, %v691_v9, -inf }
  0xea   : > { %v338_v11 = vpop.f32.mrf.mxu1  ;;  %368 = vmax.xlane.f32.xlu1 %v358_v10  ;;  %v322_v12 = vpop.f32.mrf.mxu0 }
  0xeb   : > { %v356_v13 = vsel %vm355_vm1, %v322_v12, -inf  ;;  %v360_v18 = vsel %vm355_vm1, %v338_v11, -inf }
  0xec   : > { %v692_v14 = vpop.f32.mrf.mxu1  ;;  %364 = vmax.xlane.f32.xlu0 %v356_v13  ;;  %v688_v15 = vpop.f32.mrf.mxu0 }
  0xed   : > { %v359_v16 = vsel %vm355_vm1, %v688_v15, -inf  ;;  %v363_v22 = vsel %vm355_vm1, %v692_v14, -inf }
  0xee   : > { %v341_v17 = vpop.f32.mrf.mxu1  ;;  %370 = vmax.xlane.f32.xlu1 %v359_v16  ;;  %v325_v19 = vpop.f32.mrf.mxu0 }
  0xef   : > { %v361_v20 = vsel %vm355_vm1, %v341_v17, -inf  ;;  %v357_v21 = vsel %vm355_vm1, %v325_v19, -inf }
  0xf0   : > { %372 = vmax.xlane.f32.xlu0 %v360_v18 }
  0xf2   : > { %374 = vmax.xlane.f32.xlu1 %v361_v20 }
  0xf4   : > { %366 = vmax.xlane.f32.xlu0 %v357_v21 }
  0xf6   : > { %378 = vmax.xlane.f32.xlu1 %v363_v22 }
  0xf8   : > { %376 = vmax.xlane.f32.xlu0 %v362_v23 }
 0x173   : > { %v369_v24 = vpop.xlane.xlu1 %368 }
 0x174   : > { %v382_v25 = vsub.f32 %v358_v10, %v369_v24 }
 0x175   : > { %v365_v26 = vpop.xlane.xlu0 %364 }
 0x176   : > { %v392_v27 = vmul.f32 1.442695, %v382_v25  ;;  %v380_v28 = vsub.f32 %v356_v13, %v365_v26 }
 0x177   : > { %v371_v29 = vpop.xlane.xlu1 %370 }
 0x178   : > { %776 = vpow2.f32 %v392_v27  ;;  %v388_v30 = vmul.f32 1.442695, %v380_v28  ;;  %v383_v31 = vsub.f32 %v359_v16, %v371_v29 }
 0x179   : > { %v373_v32 = vpop.xlane.xlu0 %372 }
 0x17a   : > { %v394_v33 = vmul.f32 1.442695, %v383_v31  ;;  %v384_v34 = vsub.f32 %v360_v18, %v373_v32  ;;  %778 = vpow2.f32 %v388_v30 }
 0x17b   : > { %v375_v35 = vpop.xlane.xlu1 %374 }
 0x17c   : > { %780 = vpow2.f32 %v394_v33  ;;  %v396_v36 = vmul.f32 1.442695, %v384_v34  ;;  %v385_v37 = vsub.f32 %v361_v20, %v375_v35 }
 0x17d   : > { %v367_v38 = vpop.xlane.xlu0 %366 }
 0x17e   : > { %v381_v39 = vsub.f32 %v357_v21, %v367_v38  ;;  %782 = vpow2.f32 %v396_v36  ;;  %v398_v42 = vmul.f32 1.442695, %v385_v37 }
 0x17f   : > { %v379_v40 = vpop.xlane.xlu1 %378 }
 0x180   : > { %v390_v41 = vmul.f32 1.442695, %v381_v39  ;;  %v387_v44 = vsub.f32 %v363_v22, %v379_v40 }
 0x181   : > { %v377_v43 = vpop.xlane.xlu0 %376 }
 0x182   : > { %784 = vpow2.f32 %v390_v41  ;;  %v386_v45 = vsub.f32 %v362_v23, %v377_v43  ;;  %v402_v48 = vmul.f32 1.442695, %v387_v44 }
 0x183   : > { %786 = vpow2.f32 %v398_v42 }
 0x184   : > { %v400_v46 = vmul.f32 1.442695, %v386_v45 }
 0x185   : > { %v777_v47 = vpop.eup %776 }
 0x186   : > { %788 = vpow2.f32 %v400_v46  ;;  %408 = vadd.xlane.f32.xlu0 %v777_v47 }
 0x187   : > { %v779_v49 = vpop.eup %778  ;;  %790 = vpow2.f32 %v402_v48 }
 0x189   : > { %v781_v50 = vpop.eup %780 }
 0x18a   : > { %410 = vadd.xlane.f32.xlu1 %v781_v50  ;;  %404 = vadd.xlane.f32.xlu0 %v779_v49 }
 0x18b   : > { %v783_v51 = vpop.eup %782 }
 0x18e   : > { %412 = vadd.xlane.f32.xlu0 %v783_v51 }
 0x18f   : > { %v785_v52 = vpop.eup %784 }
 0x190   : > { %406 = vadd.xlane.f32.xlu1 %v785_v52  ;;  %v787_v53 = vpop.eup %786 }
 0x193   : > { %v789_v54 = vpop.eup %788 }
 0x194   : > { %414 = vadd.xlane.f32.xlu1 %v787_v53  ;;  %416 = vadd.xlane.f32.xlu0 %v789_v54  ;;  %v791_v55 = vpop.eup %790 }
 0x198   : > { %418 = vadd.xlane.f32.xlu1 %v791_v55 }
 0x20f   : > { %v409_v56 = vpop.xlane.xlu0 %408 }
 0x210   : > { %792 = vrcp.f32 %v409_v56 }
 0x213   : > { %v411_v57 = vpop.xlane.xlu1 %410  ;;  %v405_v58 = vpop.xlane.xlu0 %404 }
 0x214   : > { %794 = vrcp.f32 %v411_v57 }
 0x215   : > { %796 = vrcp.f32 %v405_v58 }
 0x217   : > { %v413_v59 = vpop.xlane.xlu0 %412 }
 0x219   : > { %v407_v60 = vpop.xlane.xlu1 %406 }
 0x21a   : > { %798 = vrcp.f32 %v407_v60 }
 0x21b   : > { %800 = vrcp.f32 %v413_v59 }
 0x21d   : > { %v415_v61 = vpop.xlane.xlu1 %414  ;;  %v417_v62 = vpop.xlane.xlu0 %416 }
 0x21e   : > { %802 = vrcp.f32 %v415_v61  ;;  %v793_v63 = vpop.eup %792 }
 0x21f   : > { %804 = vrcp.f32 %v417_v62  ;;  %v430_v2 = vmul.f32 %v793_v63, %v777_v47 }
 0x221   : > { %v795_v0 = vpop.eup %794  ;;  %v419_v1 = vpop.xlane.xlu1 %418 }
 0x222   : > { %v431_v3 = vmul.f32 %v795_v0, %v781_v50  ;;  %806 = vrcp.f32 %v419_v1  ;;  %v797_v5 = vpop.eup %796 }
 0x223   : > { %v428_v7 = vmul.f32 %v797_v5, %v779_v49 }
 0x224   : > { %v660_v4 = vpack.c.bf16 %v431_v3, %v430_v2 }
 0x226   : > { %672 = vst [vmem:[%s205_s29 + $0x8] sm:$0xff] %v660_v4  }
 0x227   : > { %v799_v6 = vpop.eup %798 }
 0x228   : > { %v429_v8 = vmul.f32 %v799_v6, %v785_v52  ;;  %v801_v9 = vpop.eup %800 }
 0x229   : > { %v432_v12 = vmul.f32 %v801_v9, %v783_v51 }
 0x22a   : > { %v655_v10 = vpack.c.bf16 %v429_v8, %v428_v7 }
 0x22b   : > { %v803_v11 = vpop.eup %802 }
 0x22c   : > { %656 = vst [vmem:[%s205_s29] sm:$0xff] %v655_v10   ;;  %v433_v13 = vmul.f32 %v803_v11, %v787_v53  ;;  %v805_v14 = vpop.eup %804 }
 0x22d   : > { %v434_v17 = vmul.f32 %v805_v14, %v789_v54 }
 0x22e   : > { %v665_v15 = vpack.c.bf16 %v433_v13, %v432_v12 }
 0x22f   : > { %v807_v16 = vpop.eup %806 }
 0x230   : > { %673 = vst [vmem:[%s205_s29 + $0x10] sm:$0xff] %v665_v15   ;;  %v435_v18 = vmul.f32 %v807_v16, %v791_v55 }
 0x232   : > { %v670_v19 = vpack.c.bf16 %v435_v18, %v434_v17 }
 0x234   : > { %674 = vst [vmem:[%s205_s29 + $0x18] sm:$0xff] %v670_v19  }
 0x235   : > { %821 = shalt.err (!%p818_p7)
}
 0x236   : > { %s822_s25 = scalar_lea.hbm %s1017_s13, 512  ;;  %s826_s28 = scalar_lea.hbm %s1076_s2, 2048 }
 0x237   : > { %p823_p9 = scmp.ne.s32.totalorder %s1017_s13, %s822_s25  ;;  %p827_p12 = scmp.lt.s32.totalorder %s1017_s13, %s1076_s2 }
 0x238   : > { %p828_p13 = scmp.lt.s32.totalorder %s826_s28, %s822_s25 }
 0x239   : > { %p824_p10 = pnand %p823_p9, %p971_p3 }
 0x23a   : > { %p829_p0 = por %p828_p13, %p827_p12 }
 0x23b   : > { %p825_p11 = pneg %p824_p10 }
 0x23d   : > { %p830_p1 = pnand %p829_p0, %p825_p11 }
 0x23f   : > { %833 = shalt.err (!%p830_p1)
}
 0x240   : > { %s903_s3 = smov 64   ;;  %s904_s4 = smov 4  }
 0x241   : > { %697 = dma.vmem_to_hbm [thread:$0]  (%p971_p3), %s1019_s6, 512, %s1017_s13, %s1023_s8, %s903_s3, %s903_s3, %s904_s4  }
 0x242 PF: > { %p703_p2 = scmp.ge.s32.totalorder %s900_s16, 2  ;;  %s509_s5 = sand.u32 1, %s872_s9  }
 0x243   : > { %s510_s7 = scalar_lea.sflag [#allocation3], %s509_s5 }
 0x244   : > { %p700_p4 = pnand %p703_p2, %p980_p8 }
 0x246   : > { %p701_p5 = pneg %p700_p4 }
 0x248   : > { %867 = dma.done.wait (%p701_p5), %s510_s7, 512  }
 0x249   : > { %869 = vsyncadd (%p701_p5), %s510_s7, 4294966784  ;;  %s15_s16 = sadd.s32 1, %s900_s16   ;;  %s1081_s22 = sld [smem:[#allocation5_spill]] }
 0x24a   : > { %p12_p6 = scmp.ge.s32.totalorder %s15_s16, 6   ;;  %s1082_s9 = smov %s876_s10 }
 0x24b   : > { %s1083_s10 = smov %s880_s11  ;;  %s1084_s11 = smov %s989_s27 }
 0x24c   : > { %s1085_s12 = smov %s892_s14  ;;  %s1086_s13 = smov %s896_s15 }
 0x24d   : > { %s1087_s14 = smov %s1090_s19  ;;  %14 = sbr.rel (!%p12_p6) target bundleno = 5 (0x5), region = 66 }
 0x24f   : > { %s1088_s15 = smov %s1081_s22 }
 0x252   :  { %515 = vsyncpa [#allocation3], 1 }
 0x253   :  { %517 = vsyncpa [#allocation3 + $0x1], 1 }

</bundles_post_ra>
